<compile_context>
chip_gen: v5e
topology: v5e:2x2
jax: 0.10.0
libtpu: 0.0.40
codegen_flags: <defaults>
</compile_context>

<pallas_src>
import math

import jax
import jax.numpy as jnp
from jax.experimental import pallas as pl
from jax.experimental.pallas import tpu as pltpu

_LANE = 128
_SUBLANE = 8


def _round_up(n, m):
    return (n + m - 1) // m * m


def _pad2d(a, rows, cols):
    return jnp.pad(a, ((0, rows - a.shape[0]), (0, cols - a.shape[1])))


def _make_mlp_kernel(mxu_dtype):
    def mlp_kernel(x_ref, w1_ref, b1_ref, w2_ref, b2_ref, w3_ref, b3_ref, o_ref):
        # x arrives as f32 (no wrapper-side cast pass); cast for the MXU here --
        # the VPU has huge slack in this kernel so the cast is free.
        x = x_ref[...].astype(mxu_dtype)
        h1 = jnp.dot(x, w1_ref[...], preferred_element_type=jnp.float32)
        h1 = jnp.maximum(h1 + b1_ref[...], 0.0)          # f32 bias + ReLU (v5e-safe)
        h2 = jnp.dot(h1.astype(mxu_dtype), w2_ref[...],
                     preferred_element_type=jnp.float32)
        h2 = jnp.maximum(h2 + b2_ref[...], 0.0)
        logits = jnp.dot(h2.astype(mxu_dtype), w3_ref[...],
                         preferred_element_type=jnp.float32)
        # Direct (tm, num_outputs) store -- masked narrow vst, but ~64x fewer
        # HBM bytes than the old lane-padded writeback + wrapper slice.
        o_ref[...] = (logits + b3_ref[...]).astype(o_ref.dtype)

    return mlp_kernel


def mlp_forward(x, params, *, block_rows=4096, mxu_dtype=jnp.float32):
    """Fused 3-layer MLP.  x: (B, num_inputs) f32.  Returns (B, num_outputs) f32.

    mxu_dtype=jnp.float32 (default) reproduces PyTorch f32 semantics exactly;
    jnp.bfloat16 uses the bf16 MXU path with f32 accumulation / f32 bias+ReLU.
    """
    assert x.ndim == 2
    w1, b1, w2, b2, w3, b3 = params
    B, num_inputs = x.shape
    h1_dim, h2_dim, num_outputs = w1.shape[1], w2.shape[1], w3.shape[1]

    # Pad only the hidden (VMEM-internal) dims to 128 lanes; zero rows/cols are
    # exact no-ops through matmul + ReLU.  I/O feature dims stay unpadded so the
    # kernel moves exactly B*num_inputs / B*num_outputs f32 through HBM.
    h1_pad = _round_up(h1_dim, _LANE)
    h2_pad = _round_up(h2_dim, _LANE)
    w1p = _pad2d(w1, num_inputs, h1_pad).astype(mxu_dtype)
    w2p = _pad2d(w2, h1_pad, h2_pad).astype(mxu_dtype)
    w3p = _pad2d(w3, h2_pad, num_outputs).astype(mxu_dtype)
    b1p = _pad2d(b1, 1, h1_pad).astype(jnp.float32)
    b2p = _pad2d(b2, 1, h2_pad).astype(jnp.float32)
    b3p = b3.astype(jnp.float32)

    # Batch tiling: big sublane-aligned row blocks over a 1-D pipelined grid.
    # For B >= 16 cap the block at ceil(B/2) rows so the grid has >= 2 steps and
    # the "parallel" axis can shard across v7x's two TensorCores.
    tm = min(block_rows, B)
    if B > tm or B >= 2 * _SUBLANE:
        tm = min(_round_up(tm, _SUBLANE), _round_up(pl.cdiv(B, 2), _SUBLANE))
    grid = (pl.cdiv(B, tm),)

    def const_spec(a):
        # Full-array block, constant index_map -> stays VMEM-resident across steps.
        return pl.BlockSpec(a.shape, lambda i: (0, 0))

    in_specs = [
        pl.BlockSpec((tm, num_inputs), lambda i: (i, 0)),
        const_spec(w1p), const_spec(b1p),
        const_spec(w2p), const_spec(b2p),
        const_spec(w3p), const_spec(b3p),
    ]
    out_specs = pl.BlockSpec((tm, num_outputs), lambda i: (i, 0))

    # Realistic (unpadded) cost hint for XLA's scheduler.
    flops = 2 * B * (num_inputs * h1_dim + h1_dim * h2_dim + h2_dim * num_outputs)
    bytes_accessed = (
        B * num_inputs * 4 + B * num_outputs * 4
        + sum(int(p.size) * p.dtype.itemsize for p in (w1p, b1p, w2p, b2p, w3p, b3p))
    )
    cost = pl.CostEstimate(flops=int(flops), transcendentals=0,
                           bytes_accessed=int(bytes_accessed))

    return pl.pallas_call(
        _make_mlp_kernel(mxu_dtype),
        out_shape=jax.ShapeDtypeStruct((B, num_outputs), jnp.float32),
        grid=grid,
        in_specs=in_specs,
        out_specs=out_specs,
        compiler_params=pltpu.CompilerParams(
            dimension_semantics=("parallel",),
            # Narrow (tm, 2) blocks are lane-padded in VMEM (~512 B/row/buffer),
            # so the default scoped limit (16 MiB on v5e) is too small for
            # block_rows=4096; 48 MiB fits every generation's physical VMEM.
            vmem_limit_bytes=48 * 1024 * 1024,
        ),
        cost_estimate=cost,
    )(x, w1p, b1p, w2p, b2p, w3p, b3p)


def init_params(key, num_inputs, num_outputs):
    """Deterministic init mimicking PyTorch nn.Linear default (uniform +/- 1/sqrt(fan_in))."""
    dims = [(num_inputs, 30), (30, 20), (20, num_outputs)]
    params = []
    keys = jax.random.split(key, 2 * len(dims))
    for i, (fan_in, fan_out) in enumerate(dims):
        bound = 1.0 / math.sqrt(fan_in)
        w = jax.random.uniform(
            keys[2 * i], (fan_in, fan_out), jnp.float32, minval=-bound, maxval=bound
        )
        b = jax.random.uniform(
            keys[2 * i + 1], (1, fan_out), jnp.float32, minval=-bound, maxval=bound
        )
        params.extend([w, b])
    return tuple(params)


def reference_forward(x, params, mxu_dtype=jnp.float32):
    """Pure-JAX reference with the same matmul dtype recipe."""
    w1, b1, w2, b2, w3, b3 = params
    c = lambda a: a.astype(mxu_dtype)
    h1 = jnp.maximum(jnp.dot(c(x), c(w1), preferred_element_type=jnp.float32) + b1, 0.0)
    h2 = jnp.maximum(jnp.dot(c(h1), c(w2), preferred_element_type=jnp.float32) + b2, 0.0)
    return jnp.dot(c(h2), c(w3), preferred_element_type=jnp.float32) + b3


if __name__ == "__main__":
    num_inputs = 2
    num_outputs = 2

    key = jax.random.PRNGKey(0)
    kx, kp = jax.random.split(key)
    params = init_params(kp, num_inputs, num_outputs)

    # --- small single-tile batch, exact PyTorch-f32 semantics ----------------
    x = jax.random.normal(kx, (8, num_inputs), jnp.float32)
    ref = reference_forward(x, params)
    out = jax.block_until_ready(mlp_forward(x, params))
    assert out.shape == (8, num_outputs)
    assert jnp.allclose(out, ref, atol=1e-5, rtol=1e-5)

    # --- multi-step grid (tiled batch incl. a ragged final tile) -------------
    x2 = jax.random.normal(kx, (20, num_inputs), jnp.float32)
    ref2 = reference_forward(x2, params)
    out2 = jax.block_until_ready(mlp_forward(x2, params, block_rows=8))
    assert out2.shape == (20, num_outputs)
    assert jnp.allclose(out2, ref2, atol=1e-5, rtol=1e-5)

    # --- larger batch exercising the auto 2-step (dual-TensorCore) split -----
    x3 = jax.random.normal(kx, (300, num_inputs), jnp.float32)
    ref3 = reference_forward(x3, params)
    out3 = jax.block_until_ready(mlp_forward(x3, params))
    assert out3.shape == (300, num_outputs)
    assert jnp.allclose(out3, ref3, atol=1e-5, rtol=1e-5)

    # --- optional bf16-MXU fast path (f32 accumulate / f32 bias+ReLU) --------
    out_bf16 = jax.block_until_ready(
        mlp_forward(x2, params, block_rows=8, mxu_dtype=jnp.bfloat16)
    )
    ref_bf16 = reference_forward(x2, params, mxu_dtype=jnp.bfloat16)
    assert jnp.allclose(out_bf16, ref_bf16, atol=1e-3, rtol=1e-3)
    assert jnp.allclose(out_bf16, ref2, atol=5e-2, rtol=5e-2)

    print("KERNEL_OK")
</pallas_src>

<mosaic_0001>
module attributes {stable_mosaic.version = 11 : i64} {
  func.func @mlp_kernel(%arg0: i32, %arg1: memref<8x2xf32, #tpu.memory_space<vmem>>, %arg2: memref<2x128xf32, #tpu.memory_space<vmem>>, %arg3: memref<1x128xf32, #tpu.memory_space<vmem>>, %arg4: memref<128x128xf32, #tpu.memory_space<vmem>>, %arg5: memref<1x128xf32, #tpu.memory_space<vmem>>, %arg6: memref<128x2xf32, #tpu.memory_space<vmem>>, %arg7: memref<1x2xf32, #tpu.memory_space<vmem>>, %arg8: memref<8x2xf32, #tpu.memory_space<vmem>>) attributes {dimension_semantics = [#tpu.dimension_semantics<parallel>], iteration_bounds = array<i64: 1>, scalar_prefetch = 0 : i64, scratch_operands = 0 : i64, tpu.core_type = #tpu.core_type<tc>, window_params = [{transform_indices = @transform_0, window_bounds = array<i64: 8, 2>}, {pipeline_mode = #tpu.pipeline_mode<synchronous>, transform_indices = @transform_1, window_bounds = array<i64: 2, 128>}, {pipeline_mode = #tpu.pipeline_mode<synchronous>, transform_indices = @transform_2, window_bounds = array<i64: 1, 128>}, {pipeline_mode = #tpu.pipeline_mode<synchronous>, transform_indices = @transform_3, window_bounds = array<i64: 128, 128>}, {pipeline_mode = #tpu.pipeline_mode<synchronous>, transform_indices = @transform_4, window_bounds = array<i64: 1, 128>}, {pipeline_mode = #tpu.pipeline_mode<synchronous>, transform_indices = @transform_5, window_bounds = array<i64: 128, 2>}, {pipeline_mode = #tpu.pipeline_mode<synchronous>, transform_indices = @transform_6, window_bounds = array<i64: 1, 2>}, {transform_indices = @transform_7, window_bounds = array<i64: 8, 2>}]} {
    %c0 = arith.constant 0 : index
    %c0_0 = arith.constant 0 : index
    %0 = vector.load %arg1[%c0, %c0_0] : memref<8x2xf32, #tpu.memory_space<vmem>>, vector<8x2xf32>
    %c0_1 = arith.constant 0 : index
    %c0_2 = arith.constant 0 : index
    %1 = vector.load %arg2[%c0_1, %c0_2] : memref<2x128xf32, #tpu.memory_space<vmem>>, vector<2x128xf32>
    %cst = arith.constant dense<0.000000e+00> : vector<8x128xf32>
    %2 = tpu.matmul %0, %1, %cst {dimension_numbers = #tpu.dot_dimension_numbers<[1], [0], [0], [1], [0, 0, 1, 1], [], []>} : vector<8x2xf32>, vector<2x128xf32>, vector<8x128xf32> -> vector<8x128xf32>
    %c0_3 = arith.constant 0 : index
    %c0_4 = arith.constant 0 : index
    %3 = vector.load %arg3[%c0_3, %c0_4] : memref<1x128xf32, #tpu.memory_space<vmem>>, vector<1x128xf32>
    %4 = vector.broadcast %3 : vector<1x128xf32> to vector<8x128xf32>
    %5 = arith.addf %2, %4 : vector<8x128xf32>
    %cst_5 = arith.constant 0.000000e+00 : f32
    %6 = vector.broadcast %cst_5 : f32 to vector<8x128xf32>
    %7 = arith.maximumf %5, %6 : vector<8x128xf32>
    %c0_6 = arith.constant 0 : index
    %c0_7 = arith.constant 0 : index
    %8 = vector.load %arg4[%c0_6, %c0_7] : memref<128x128xf32, #tpu.memory_space<vmem>>, vector<128x128xf32>
    %cst_8 = arith.constant dense<0.000000e+00> : vector<8x128xf32>
    %9 = tpu.matmul %7, %8, %cst_8 {dimension_numbers = #tpu.dot_dimension_numbers<[1], [0], [0], [1], [0, 0, 1, 1], [], []>} : vector<8x128xf32>, vector<128x128xf32>, vector<8x128xf32> -> vector<8x128xf32>
    %c0_9 = arith.constant 0 : index
    %c0_10 = arith.constant 0 : index
    %10 = vector.load %arg5[%c0_9, %c0_10] : memref<1x128xf32, #tpu.memory_space<vmem>>, vector<1x128xf32>
    %11 = vector.broadcast %10 : vector<1x128xf32> to vector<8x128xf32>
    %12 = arith.addf %9, %11 : vector<8x128xf32>
    %cst_11 = arith.constant 0.000000e+00 : f32
    %13 = vector.broadcast %cst_11 : f32 to vector<8x128xf32>
    %14 = arith.maximumf %12, %13 : vector<8x128xf32>
    %c0_12 = arith.constant 0 : index
    %c0_13 = arith.constant 0 : index
    %15 = vector.load %arg6[%c0_12, %c0_13] : memref<128x2xf32, #tpu.memory_space<vmem>>, vector<128x2xf32>
    %cst_14 = arith.constant dense<0.000000e+00> : vector<8x2xf32>
    %16 = tpu.matmul %14, %15, %cst_14 {dimension_numbers = #tpu.dot_dimension_numbers<[1], [0], [0], [1], [0, 0, 1, 1], [], []>} : vector<8x128xf32>, vector<128x2xf32>, vector<8x2xf32> -> vector<8x2xf32>
    %c0_15 = arith.constant 0 : index
    %c0_16 = arith.constant 0 : index
    %17 = vector.load %arg7[%c0_15, %c0_16] : memref<1x2xf32, #tpu.memory_space<vmem>>, vector<1x2xf32>
    %18 = vector.broadcast %17 : vector<1x2xf32> to vector<8x2xf32>
    %19 = arith.addf %16, %18 : vector<8x2xf32>
    %c0_17 = arith.constant 0 : index
    %c0_18 = arith.constant 0 : index
    %20 = vector.load %arg8[%c0_17, %c0_18] : memref<8x2xf32, #tpu.memory_space<vmem>>, vector<8x2xf32>
    tpu.vector_store %arg8[%c0_17, %c0_18], %19 {strides = array<i32>} : memref<8x2xf32, #tpu.memory_space<vmem>>, vector<8x2xf32>,
    return
  }
  func.func @transform_0(%arg0: i32) -> (i32, i32) {
    %c0_i32 = arith.constant 0 : i32
    %c0_i32_0 = arith.constant 0 : i32
    return %arg0, %c0_i32 : i32, i32
  }
  func.func @transform_1(%arg0: i32) -> (i32, i32) {
    %c0_i32 = arith.constant 0 : i32
    %c0_i32_0 = arith.constant 0 : i32
    %c0_i32_1 = arith.constant 0 : i32
    return %c0_i32, %c0_i32_0 : i32, i32
  }
  func.func @transform_2(%arg0: i32) -> (i32, i32) {
    %c0_i32 = arith.constant 0 : i32
    %c0_i32_0 = arith.constant 0 : i32
    %c0_i32_1 = arith.constant 0 : i32
    return %c0_i32, %c0_i32_0 : i32, i32
  }
  func.func @transform_3(%arg0: i32) -> (i32, i32) {
    %c0_i32 = arith.constant 0 : i32
    %c0_i32_0 = arith.constant 0 : i32
    %c0_i32_1 = arith.constant 0 : i32
    return %c0_i32, %c0_i32_0 : i32, i32
  }
  func.func @transform_4(%arg0: i32) -> (i32, i32) {
    %c0_i32 = arith.constant 0 : i32
    %c0_i32_0 = arith.constant 0 : i32
    %c0_i32_1 = arith.constant 0 : i32
    return %c0_i32, %c0_i32_0 : i32, i32
  }
  func.func @transform_5(%arg0: i32) -> (i32, i32) {
    %c0_i32 = arith.constant 0 : i32
    %c0_i32_0 = arith.constant 0 : i32
    %c0_i32_1 = arith.constant 0 : i32
    return %c0_i32, %c0_i32_0 : i32, i32
  }
  func.func @transform_6(%arg0: i32) -> (i32, i32) {
    %c0_i32 = arith.constant 0 : i32
    %c0_i32_0 = arith.constant 0 : i32
    %c0_i32_1 = arith.constant 0 : i32
    return %c0_i32, %c0_i32_0 : i32, i32
  }
  func.func @transform_7(%arg0: i32) -> (i32, i32) {
    %c0_i32 = arith.constant 0 : i32
    %c0_i32_0 = arith.constant 0 : i32
    return %arg0, %c0_i32 : i32, i32
  }
}

</mosaic_0001>

<bundles_post_ra>
// kernel: tpu_custom_call.1
= control target key start
LH: loop header
LB: loop body
LE: loop exit
PB: predicated region body
PF: predicated region fallthrough
CT: control target
= control target key end

     0   :  { %vm36_vm0 = vcmask 1041408   ;;  %vm32_vm1 = vcmask 15360   ;;  %s308_s1 = inlined_call_operand.vmem [shape: f32[2,128], index: 1, kind: input, shape index: {}]   ;;  %s309_s0 = inlined_call_operand.vmem [shape: f32[8,2], index: 0, kind: input, shape index: {}]   ;;  %s310_s3 = inlined_call_operand.vmem [shape: f32[128,128], index: 3, kind: input, shape index: {}]   ;;  %s311_s2 = inlined_call_operand.vmem [shape: f32[1,128], index: 2, kind: input, shape index: {}]   ;;  %s312_s4 = inlined_call_operand.vmem [shape: f32[1,128], index: 4, kind: input, shape index: {}]   ;;  %s313_s5 = inlined_call_operand.vmem [shape: f32[128,2], index: 5, kind: input, shape index: {}]   ;;  %s314_s6 = inlined_call_operand.vmem [shape: f32[1,2], index: 6, kind: input, shape index: {}]   ;;  %s315_s7 = inlined_call_operand.vmem [shape: f32[8,2], index: 7, kind: output, shape index: {}]  }
   0x1   :  { %v27_v0 = vld [vmem:[%s308_s1] sm:$0x3]  ;;  %v76_v2 = vld [vmem:[%s310_s3 + $0x78] sm:$0xff]  ;;  %v75_v3 = vld [vmem:[%s310_s3 + $0x70] sm:$0xff] }
   0x2   :  { %v26_v1 = vld [vmem:[%s309_s0] sm:$0xff]  ;;  %147 = vmatpush.msk.msra.mxu0 %vm36_vm0, %v27_v0  ;;  %81 = vmatpush.msra.mxu1 %v76_v2  ;;  %v74_v4 = vld [vmem:[%s310_s3 + $0x68] sm:$0xff]  ;;  %v72_v6 = vld [vmem:[%s310_s3 + $0x58] sm:$0xff] }
   0x3   :  { %148 = vmatmul.msk.f32.vlgmr.msra.gmra.mxu0 %vm32_vm1, %v26_v1  ;;  %v73_v5 = vld [vmem:[%s310_s3 + $0x60] sm:$0xff]  ;;  %v71_v7 = vld [vmem:[%s310_s3 + $0x50] sm:$0xff]  ;;  %v70_v8 = vld [vmem:[%s310_s3 + $0x48] sm:$0xff] }
   0x4   :  { %82 = vmatpush.msra.mxu1 %v75_v3  ;;  %v69_v9 = vld [vmem:[%s310_s3 + $0x40] sm:$0xff]  ;;  %v68_v10 = vld [vmem:[%s310_s3 + $0x38] sm:$0xff]  ;;  %v67_v11 = vld [vmem:[%s310_s3 + $0x30] sm:$0xff] }
   0x5   :  { %v66_v12 = vld [vmem:[%s310_s3 + $0x28] sm:$0xff]  ;;  %v65_v13 = vld [vmem:[%s310_s3 + $0x20] sm:$0xff]  ;;  %v64_v14 = vld [vmem:[%s310_s3 + $0x18] sm:$0xff] }
   0x6   :  { %83 = vmatpush.msra.mxu1 %v74_v4  ;;  %v63_v15 = vld [vmem:[%s310_s3 + $0x10] sm:$0xff]  ;;  %v62_v16 = vld [vmem:[%s310_s3 + $0x8] sm:$0xff]  ;;  %v61_v17 = vld [vmem:[%s310_s3] sm:$0xff] }
   0x7   :  { %v117_v18 = vld [vmem:[%s313_s5 + $0x78] sm:$0xff]  ;;  %v116_v19 = vld [vmem:[%s313_s5 + $0x70] sm:$0xff]  ;;  %v115_v20 = vld [vmem:[%s313_s5 + $0x68] sm:$0xff] }
   0x8   :  { %84 = vmatpush.msra.mxu1 %v73_v5  ;;  %122 = vmatpush.msra.mxu2 %v117_v18  ;;  %v114_v21 = vld [vmem:[%s313_s5 + $0x60] sm:$0xff]  ;;  %v113_v22 = vld [vmem:[%s313_s5 + $0x58] sm:$0xff]  ;;  %v112_v23 = vld [vmem:[%s313_s5 + $0x50] sm:$0xff] }
   0x9   :  { %v111_v24 = vld [vmem:[%s313_s5 + $0x48] sm:$0xff]  ;;  %v110_v25 = vld [vmem:[%s313_s5 + $0x40] sm:$0xff]  ;;  %v109_v26 = vld [vmem:[%s313_s5 + $0x38] sm:$0xff] }
   0xa   :  { %85 = vmatpush.msra.mxu1 %v72_v6  ;;  %123 = vmatpush.msra.mxu2 %v116_v19  ;;  %v108_v27 = vld [vmem:[%s313_s5 + $0x30] sm:$0xff]  ;;  %v107_v28 = vld [vmem:[%s313_s5 + $0x28] sm:$0xff]  ;;  %v106_v29 = vld [vmem:[%s313_s5 + $0x20] sm:$0xff] }
   0xb   :  { %v105_v30 = vld [vmem:[%s313_s5 + $0x18] sm:$0xff]  ;;  %v149_v31 = vld [vmem:[%s311_s2] ss:$0 sm:$0xff]  ;;  %v104_v35 = vld [vmem:[%s313_s5 + $0x10] sm:$0xff] }
   0xc   :  { %86 = vmatpush.msra.mxu1 %v71_v7  ;;  %124 = vmatpush.msra.mxu2 %v115_v20  ;;  %v103_v36 = vld [vmem:[%s313_s5 + $0x8] sm:$0xff]  ;;  %v102_v37 = vld [vmem:[%s313_s5] sm:$0xff] }
   0xd   :  { %v150_v38 = vld [vmem:[%s312_s4] ss:$0 sm:$0xff] }
   0xe   :  { %87 = vmatpush.msra.mxu1 %v70_v8  ;;  %125 = vmatpush.msra.mxu2 %v114_v21  ;;  %v151_v42 = vld [vmem:[%s314_s6] ss:$0 sm:$0xff] }
  0x10   :  { %88 = vmatpush.msra.mxu1 %v69_v9  ;;  %126 = vmatpush.msra.mxu2 %v113_v22 }
  0x12   :  { %89 = vmatpush.msra.mxu1 %v68_v10  ;;  %127 = vmatpush.msra.mxu2 %v112_v23 }
  0x14   :  { %90 = vmatpush.msra.mxu1 %v67_v11  ;;  %128 = vmatpush.msra.mxu2 %v111_v24 }
  0x16   :  { %91 = vmatpush.msra.mxu1 %v66_v12  ;;  %129 = vmatpush.msra.mxu2 %v110_v25 }
  0x18   :  { %92 = vmatpush.msra.mxu1 %v65_v13  ;;  %130 = vmatpush.msra.mxu2 %v109_v26 }
  0x1a   :  { %93 = vmatpush.msra.mxu1 %v64_v14  ;;  %131 = vmatpush.msra.mxu2 %v108_v27 }
  0x1c   :  { %94 = vmatpush.msra.mxu1 %v63_v15  ;;  %132 = vmatpush.msra.mxu2 %v107_v28 }
  0x1e   :  { %95 = vmatpush.msra.mxu1 %v62_v16  ;;  %133 = vmatpush.msra.mxu2 %v106_v29 }
  0x20   :  { %96 = vmatpush.msra.mxu1 %v61_v17  ;;  %134 = vmatpush.msra.mxu2 %v105_v30 }
  0x22   :  { %135 = vmatpush.msra.mxu2 %v104_v35 }
  0x24   :  { %136 = vmatpush.msra.mxu2 %v103_v36 }
  0x26   :  { %137 = vmatpush.msra.mxu2 %v102_v37 }
  0x80   :  { %v57_v32 = vpop.f32.mrf.mxu0 }
  0x81   :  { %v58_v33 = vadd.f32 %v149_v31, %v57_v32 }
  0x83   :  { %v60_v34 = vmax.f32 %v58_v33, 0.0 }
  0x85   :  { %97 = vmatmul.f32.vlgmr.msra.gmra.mxu1 %v60_v34 }
 0x102   :  { %v98_v39 = vpop.f32.mrf.mxu1 }
 0x103   :  { %v99_v40 = vadd.f32 %v150_v38, %v98_v39 }
 0x105   :  { %v101_v41 = vmax.f32 %v99_v40, 0.0 }
 0x107   :  { %138 = vmatmul.f32.vlgmr.msra.gmra.mxu2 %v101_v41 }
 0x18a   :  { %v139_v43 = vpop.f32.mrf.mxu2 }
 0x18b   :  { %v140_v44 = vadd.f32 %v151_v42, %v139_v43 }
 0x18d   :  { %142 = vst.msk [vmem:[%s315_s7] sm:$0xff] %vm32_vm1, %v140_v44 }

</bundles_post_ra>
